<compile_context>
chip_gen: v5e
topology: v5e:2x2
jax: 0.10.0
libtpu: 0.0.40
codegen_flags: <defaults>
</compile_context>

<pallas_src>
import jax
import jax.numpy as jnp
from jax import lax
from jax.experimental import pallas as pl
from jax.experimental.pallas import tpu as pltpu

NEG_BIG = -1e30  # padding-lane logit: exp() underflows to 0, keeps log_softmax exact
LANE_PAD = 128   # lane-dense slab width for pre / logits


# --------------------------- Pass 1: serial recurrence ---------------------------

def _recurrent_kernel(hid0_ref, ci_ref, w1ci_ref, b1_ref, w1h_ref,
                      pre_ref, hid_scr):
    """One time-block of the recurrence.

    Emits pre[t] = cat(hidden_new_t, out1_t) (zero-padded to 128 lanes) for
    every step in the block and keeps the hidden carry in `hid_scr` across
    grid iterations.
    """
    blk = pl.program_id(0)

    # Initialize the cross-block hidden carry from hidden0 once.
    @pl.when(blk == 0)
    def _():
        hid_scr[...] = hid0_ref[...]

    tb, bp, k1 = ci_ref.shape
    npad = w1ci_ref.shape[1]

    # Hoisted input GEMM for the whole Tb block (off the serial chain):
    # one MXU pass with M = Tb*Bp rows instead of Tb tiny per-step pushes.
    xc = jnp.dot(ci_ref[...].reshape(tb * bp, k1), w1ci_ref[...],
                 preferred_element_type=jnp.float32) + b1_ref[...]
    pre_ref[...] = xc.reshape(tb, bp, npad)   # stage into the lane-dense output

    w1h = w1h_ref[...]

    # Serial chain: one small matmul + add per step; hidden carried in vregs.
    # (W1_h rows >= H are zero, so carrying the full 128-lane `pre` slab as the
    #  hidden state is exact and avoids per-step lane slicing.)
    def step(t, hid):
        pre = pre_ref[t] + jnp.dot(hid.astype(w1h.dtype), w1h,
                                   preferred_element_type=jnp.float32)
        pre_ref[t] = pre
        return pre

    hid_scr[...] = lax.fori_loop(0, tb, step, hid_scr[...], unroll=True)


# ----------------------- Pass 2: deferred o2o + log_softmax -----------------------

def _output_kernel(pre_ref, w2_ref, b2_ref, logp_ref):
    tb, bp, npad = pre_ref.shape
    x = pre_ref[...].reshape(tb * bp, npad)
    out2 = jnp.dot(x.astype(w2_ref.dtype), w2_ref[...],
                   preferred_element_type=jnp.float32) + b2_ref[...]
    # log_softmax over the lane axis; padded lanes hold ~-1e30 -> exp() == 0.
    m = jnp.max(out2, axis=-1, keepdims=True)
    z = out2 - m
    lse = jnp.log(jnp.sum(jnp.exp(z), axis=-1, keepdims=True))
    logp_ref[...] = (z - lse).reshape(tb, bp, npad)


# ----------------------------------- wrapper -----------------------------------

def rnn_sequence(category, inputs, hidden0, params, tb=8):
    """Run T RNN steps (two pallas_calls: serial recurrence + parallel output pass).

    category: (B, n_cat) or (T, B, n_cat)
    inputs:   (T, B, input_size)
    hidden0:  (B, hidden_size)
    returns:  (log_probs (T, B, output_size), hidden_final (B, hidden_size))
    """
    T, B, _ = inputs.shape
    H = params["hidden_size"]
    O = params["output_size"]
    w1_ci, w1_h, b1 = params["w1_ci"], params["w1_h"], params["b1"]
    w2, b2 = params["w2"], params["b2"]
    K1 = w1_ci.shape[0]
    NP = w1_ci.shape[1]            # 128-lane padded slab width
    act_dtype = w1_ci.dtype        # MXU activation dtype (bf16 or f32)

    if category.ndim == 2:
        category = jnp.broadcast_to(category[None], (T,) + category.shape)
    ci = jnp.concatenate([category.astype(jnp.float32),
                          inputs.astype(jnp.float32)], axis=-1).astype(act_dtype)

    # Pad batch to a sublane multiple and time to a block multiple.
    # (Padded batch rows evolve under bias-only dynamics and padded lanes hold
    #  junk/-inf-ish values; all of it is sliced off below.)
    Bp = max(8, ((B + 7) // 8) * 8)
    Tb = max(1, min(tb, T))
    Tp = ((T + Tb - 1) // Tb) * Tb
    if (Tp, Bp) != (T, B):
        ci = jnp.pad(ci, ((0, Tp - T), (0, Bp - B), (0, 0)))
    hid0 = jnp.pad(hidden0.astype(jnp.float32), ((0, Bp - B), (0, NP - H)))

    const = lambda b: (0, 0)
    grid = (Tp // Tb,)

    # Pass 1: serial recurrence -> per-step pre = [hidden_new | out1 | 0pad].
    # Weight BlockSpecs use constant index maps so they stay VMEM-resident.
    # TODO(synk): for production sizes on v7x (64 MiB VMEM), set
    # vmem_limit_bytes and single-buffer the constant weight specs.
    pre = pl.pallas_call(
        _recurrent_kernel,
        out_shape=jax.ShapeDtypeStruct((Tp, Bp, NP), jnp.float32),
        grid=grid,
        in_specs=[
            pl.BlockSpec((Bp, NP), const),                  # hidden0 slab
            pl.BlockSpec((Tb, Bp, K1), lambda b: (b, 0, 0)),  # ci time block
            pl.BlockSpec((K1, NP), const),                  # W1 [cat|input] (padded)
            pl.BlockSpec((1, NP), const),                   # b1 = [b_i2h|b_i2o|0]
            pl.BlockSpec((NP, NP), const),                  # W1 [hidden] (padded)
        ],
        out_specs=pl.BlockSpec((Tb, Bp, NP), lambda b: (b, 0, 0)),
        scratch_shapes=[pltpu.VMEM((Bp, NP), jnp.float32)],  # hidden carry
        compiler_params=pltpu.CompilerParams(
            dimension_semantics=("arbitrary",)),            # sequential recurrence
    )(hid0, ci, w1_ci, b1, w1_h)

    # Pass 2: deferred o2o + log_softmax (time-parallel; 2 TCs on v7x).
    logp = pl.pallas_call(
        _output_kernel,
        out_shape=jax.ShapeDtypeStruct((Tp, Bp, NP), jnp.float32),
        grid=grid,
        in_specs=[
            pl.BlockSpec((Tb, Bp, NP), lambda b: (b, 0, 0)),  # pre time block
            pl.BlockSpec((NP, NP), const),                    # W2 (o2o, padded)
            pl.BlockSpec((1, NP), const),                     # b2 (-1e30 pad lanes)
        ],
        out_specs=pl.BlockSpec((Tb, Bp, NP), lambda b: (b, 0, 0)),
        compiler_params=pltpu.CompilerParams(
            dimension_semantics=("parallel",)),
    )(pre, w2, b2)

    hid_final = pre[T - 1, :B, :H]          # hidden_new of the last real step
    return logp[:T, :B, :O], hid_final


def rnn_forward(category, inp, hidden, params):
    """Single step — exact equivalent of the PyTorch module's forward().

    TODO(synk): for autoregressive sampling, keep the whole token loop inside
    rnn_sequence (or one kernel) instead of calling this per token — a T=1
    pallas_call is dominated by launch/DMA setup, not compute.
    """
    logp, hid_new = rnn_sequence(category, inp[None], hidden, params)
    return logp[0], hid_new


def init_hidden(hidden_size):
    return jnp.zeros((1, hidden_size), dtype=jnp.float32)


def init_params(key, n_categories, input_size, hidden_size, output_size,
                weights_dtype=jnp.bfloat16, lane_pad=LANE_PAD):
    """nn.Linear-style init (uniform +-1/sqrt(fan_in)); weights stored
    transposed (in_features, out_features), fused (i2h|i2o) and lane-padded
    for the kernel.  MXU weights may be bf16; biases stay f32."""
    ks = jax.random.split(key, 6)
    fan1 = n_categories + input_size + hidden_size
    fan2 = hidden_size + output_size
    s1 = 1.0 / jnp.sqrt(fan1)
    s2 = 1.0 / jnp.sqrt(fan2)

    w_i2h = jax.random.uniform(ks[0], (fan1, hidden_size), jnp.float32, -s1, s1)
    b_i2h = jax.random.uniform(ks[1], (1, hidden_size), jnp.float32, -s1, s1)
    w_i2o = jax.random.uniform(ks[2], (fan1, output_size), jnp.float32, -s1, s1)
    b_i2o = jax.random.uniform(ks[3], (1, output_size), jnp.float32, -s1, s1)
    w_o2o = jax.random.uniform(ks[4], (fan2, output_size), jnp.float32, -s2, s2)
    b_o2o = jax.random.uniform(ks[5], (1, output_size), jnp.float32, -s2, s2)

    k1 = n_categories + input_size
    n1 = hidden_size + output_size
    assert n1 <= lane_pad and fan2 <= lane_pad and output_size <= lane_pad

    w1 = jnp.concatenate([w_i2h, w_i2o], axis=1)                 # (fan1, n1)
    # [cat|input] chunk: (k1, 128);  [hidden] chunk: (128, 128) with zero rows
    # beyond H so the padded hidden slab lanes never feed the recurrence.
    w1_ci = jnp.pad(w1[:k1], ((0, 0), (0, lane_pad - n1)))
    w1_h = jnp.pad(w1[k1:], ((0, lane_pad - hidden_size), (0, lane_pad - n1)))
    b1 = jnp.pad(jnp.concatenate([b_i2h, b_i2o], axis=1),
                 ((0, 0), (0, lane_pad - n1)))
    w2 = jnp.pad(w_o2o, ((0, lane_pad - fan2), (0, lane_pad - output_size)))
    b2 = jnp.pad(b_o2o, ((0, 0), (0, lane_pad - output_size)),
                 constant_values=NEG_BIG)

    return {
        "w1_ci": w1_ci.astype(weights_dtype),
        "w1_h": w1_h.astype(weights_dtype),
        "b1": b1,                                   # f32
        "w2": w2.astype(weights_dtype),
        "b2": b2,                                   # f32 (keeps -1e30 pad exact)
        "hidden_size": hidden_size,
        "output_size": output_size,
        # raw (unfused) f32 weights, used only by the pure-JAX reference
        "raw": {"w_i2h": w_i2h, "b_i2h": b_i2h,
                "w_i2o": w_i2o, "b_i2o": b_i2o,
                "w_o2o": w_o2o, "b_o2o": b_o2o},
    }


# ----------------------------- pure-JAX reference -----------------------------

def _mm(a, b):
    return jnp.matmul(a, b, precision=jax.lax.Precision.HIGHEST)


def rnn_reference_step(category, inp, hidden, raw):
    ic = jnp.concatenate([category, inp, hidden], axis=1)
    hidden_new = _mm(ic, raw["w_i2h"]) + raw["b_i2h"]
    out = _mm(ic, raw["w_i2o"]) + raw["b_i2o"]
    out = _mm(jnp.concatenate([hidden_new, out], axis=1), raw["w_o2o"]) + raw["b_o2o"]
    return jax.nn.log_softmax(out, axis=1), hidden_new


def rnn_reference_sequence(category, inputs, hidden0, raw):
    if category.ndim == 2:
        category = jnp.broadcast_to(category[None],
                                    (inputs.shape[0],) + category.shape)

    def step(hid, xs):
        cat_t, inp_t = xs
        out, hid_new = rnn_reference_step(cat_t, inp_t, hid, raw)
        return hid_new, out

    hid_final, outs = lax.scan(step, hidden0, (category, inputs))
    return outs, hid_final


if __name__ == "__main__":
    n_categories = 8
    input_size, hidden_size, output_size = 16, 32, 16
    batch, seq_len = 2, 8

    key = jax.random.PRNGKey(0)
    kp, kc, ki = jax.random.split(key, 3)

    category = jax.nn.one_hot(
        jax.random.randint(kc, (batch,), 0, n_categories), n_categories,
        dtype=jnp.float32)
    inputs = jax.random.normal(ki, (seq_len, batch, input_size), dtype=jnp.float32)
    hidden0 = jnp.zeros((batch, hidden_size), dtype=jnp.float32)

    # f32 weights: tight correctness check.  bf16 weights (production MXU path):
    # looser tolerance (bf16 rounding compounds over the recurrence).
    for wdtype, tol in ((jnp.float32, 1e-3), (jnp.bfloat16, 5e-2)):
        params = init_params(kp, n_categories, input_size, hidden_size,
                             output_size, weights_dtype=wdtype)
        raw = params["raw"]

        # --- single step: exact module forward() semantics --------------------
        out1, hid1 = rnn_forward(category, inputs[0], hidden0, params)
        out1 = jax.block_until_ready(out1)
        hid1 = jax.block_until_ready(hid1)
        ref_out1, ref_hid1 = rnn_reference_step(category, inputs[0], hidden0, raw)
        assert out1.shape == (batch, output_size)
        assert hid1.shape == (batch, hidden_size)
        assert jnp.allclose(out1, ref_out1, atol=tol, rtol=tol), wdtype
        assert jnp.allclose(hid1, ref_hid1, atol=tol, rtol=tol), wdtype

        # --- full sequence (blocked time axis, two-pass structure) ------------
        outs, hid_final = rnn_sequence(category, inputs, hidden0, params, tb=8)
        outs = jax.block_until_ready(outs)
        hid_final = jax.block_until_ready(hid_final)
        ref_outs, ref_hid = rnn_reference_sequence(category, inputs, hidden0, raw)
        assert outs.shape == (seq_len, batch, output_size)
        assert hid_final.shape == (batch, hidden_size)
        assert jnp.allclose(outs, ref_outs, atol=tol, rtol=tol), wdtype
        assert jnp.allclose(hid_final, ref_hid, atol=tol, rtol=tol), wdtype

    print("KERNEL_OK")
</pallas_src>

<mosaic_0001>
module attributes {stable_mosaic.version = 11 : i64} {
  func.func @_recurrent_kernel(%arg0: i32, %arg1: memref<8x128xf32, #tpu.memory_space<vmem>>, %arg2: memref<1x8x24xf32, #tpu.memory_space<vmem>>, %arg3: memref<24x128xf32, #tpu.memory_space<vmem>>, %arg4: memref<1x128xf32, #tpu.memory_space<vmem>>, %arg5: memref<128x128xf32, #tpu.memory_space<vmem>>, %arg6: memref<1x8x128xf32, #tpu.memory_space<vmem>>, %arg7: memref<8x128xf32, #tpu.memory_space<vmem>>) attributes {dimension_semantics = [#tpu.dimension_semantics<arbitrary>], iteration_bounds = array<i64: 1>, scalar_prefetch = 0 : i64, scratch_operands = 1 : i64, tpu.core_type = #tpu.core_type<tc>, window_params = [{pipeline_mode = #tpu.pipeline_mode<synchronous>, transform_indices = @transform_0, window_bounds = array<i64: 8, 128>}, {transform_indices = @transform_1, window_bounds = array<i64: 1, 8, 24>}, {pipeline_mode = #tpu.pipeline_mode<synchronous>, transform_indices = @transform_2, window_bounds = array<i64: 24, 128>}, {pipeline_mode = #tpu.pipeline_mode<synchronous>, transform_indices = @transform_3, window_bounds = array<i64: 1, 128>}, {pipeline_mode = #tpu.pipeline_mode<synchronous>, transform_indices = @transform_4, window_bounds = array<i64: 128, 128>}, {transform_indices = @transform_5, window_bounds = array<i64: 1, 8, 128>}]} {
    %c0_i32 = arith.constant 0 : i32
    %0 = arith.cmpi eq, %arg0, %c0_i32 : i32
    %1 = arith.extui %0 : i1 to i32
    %c0_i32_0 = arith.constant 0 : i32
    %2 = arith.cmpi ne, %1, %c0_i32_0 : i32
    scf.if %2 {
      %c0_22 = arith.constant 0 : index
      %c0_23 = arith.constant 0 : index
      %24 = vector.load %arg1[%c0_22, %c0_23] : memref<8x128xf32, #tpu.memory_space<vmem>>, vector<8x128xf32>
      %c0_24 = arith.constant 0 : index
      %c0_25 = arith.constant 0 : index
      %25 = vector.load %arg7[%c0_24, %c0_25] : memref<8x128xf32, #tpu.memory_space<vmem>>, vector<8x128xf32>
      tpu.vector_store %arg7[%c0_24, %c0_25], %24 {strides = array<i32>} : memref<8x128xf32, #tpu.memory_space<vmem>>, vector<8x128xf32>,
    } else {
    }
    %c0 = arith.constant 0 : index
    %c0_1 = arith.constant 0 : index
    %c0_2 = arith.constant 0 : index
    %3 = vector.load %arg2[%c0, %c0_1, %c0_2] : memref<1x8x24xf32, #tpu.memory_space<vmem>>, vector<1x8x24xf32>
    %4 = vector.shape_cast %3 : vector<1x8x24xf32> to vector<8x24xf32>
    %c0_3 = arith.constant 0 : index
    %c0_4 = arith.constant 0 : index
    %5 = vector.load %arg3[%c0_3, %c0_4] : memref<24x128xf32, #tpu.memory_space<vmem>>, vector<24x128xf32>
    %cst = arith.constant dense<0.000000e+00> : vector<8x128xf32>
    %6 = tpu.matmul %4, %5, %cst {dimension_numbers = #tpu.dot_dimension_numbers<[1], [0], [0], [1], [0, 0, 1, 1], [], []>} : vector<8x24xf32>, vector<24x128xf32>, vector<8x128xf32> -> vector<8x128xf32>
    %c0_5 = arith.constant 0 : index
    %c0_6 = arith.constant 0 : index
    %7 = vector.load %arg4[%c0_5, %c0_6] : memref<1x128xf32, #tpu.memory_space<vmem>>, vector<1x128xf32>
    %8 = vector.broadcast %7 : vector<1x128xf32> to vector<8x128xf32>
    %9 = arith.addf %6, %8 : vector<8x128xf32>
    %10 = vector.shape_cast %9 : vector<8x128xf32> to vector<1x8x128xf32>
    %c0_7 = arith.constant 0 : index
    %c0_8 = arith.constant 0 : index
    %c0_9 = arith.constant 0 : index
    %11 = vector.load %arg6[%c0_7, %c0_8, %c0_9] : memref<1x8x128xf32, #tpu.memory_space<vmem>>, vector<1x8x128xf32>
    tpu.vector_store %arg6[%c0_7, %c0_8, %c0_9], %10 {strides = array<i32>} : memref<1x8x128xf32, #tpu.memory_space<vmem>>, vector<1x8x128xf32>,
    %c0_10 = arith.constant 0 : index
    %c0_11 = arith.constant 0 : index
    %12 = vector.load %arg5[%c0_10, %c0_11] : memref<128x128xf32, #tpu.memory_space<vmem>>, vector<128x128xf32>
    %c0_12 = arith.constant 0 : index
    %c0_13 = arith.constant 0 : index
    %13 = vector.load %arg7[%c0_12, %c0_13] : memref<8x128xf32, #tpu.memory_space<vmem>>, vector<8x128xf32>
    %c0_i32_14 = arith.constant 0 : i32
    %14 = arith.index_cast %c0_i32_14 : i32 to index
    %c0_15 = arith.constant 0 : index
    %c0_16 = arith.constant 0 : index
    %15 = vector.load %arg6[%14, %c0_15, %c0_16] : memref<1x8x128xf32, #tpu.memory_space<vmem>>, vector<1x8x128xf32>
    %16 = vector.shape_cast %15 : vector<1x8x128xf32> to vector<8x128xf32>
    %cst_17 = arith.constant dense<0.000000e+00> : vector<8x128xf32>
    %17 = tpu.matmul %13, %12, %cst_17 {dimension_numbers = #tpu.dot_dimension_numbers<[1], [0], [0], [1], [0, 0, 1, 1], [], []>} : vector<8x128xf32>, vector<128x128xf32>, vector<8x128xf32> -> vector<8x128xf32>
    %18 = arith.addf %16, %17 : vector<8x128xf32>
    %19 = arith.index_cast %c0_i32_14 : i32 to index
    %c0_18 = arith.constant 0 : index
    %c0_19 = arith.constant 0 : index
    %20 = vector.load %arg6[%19, %c0_18, %c0_19] : memref<1x8x128xf32, #tpu.memory_space<vmem>>, vector<1x8x128xf32>
    %21 = vector.shape_cast %20 : vector<1x8x128xf32> to vector<8x128xf32>
    %22 = vector.shape_cast %18 : vector<8x128xf32> to vector<1x8x128xf32>
    tpu.vector_store %arg6[%19, %c0_18, %c0_19], %22 {strides = array<i32>} : memref<1x8x128xf32, #tpu.memory_space<vmem>>, vector<1x8x128xf32>,
    %c1_i32 = arith.constant 1 : i32
    %c0_20 = arith.constant 0 : index
    %c0_21 = arith.constant 0 : index
    %23 = vector.load %arg7[%c0_20, %c0_21] : memref<8x128xf32, #tpu.memory_space<vmem>>, vector<8x128xf32>
    tpu.vector_store %arg7[%c0_20, %c0_21], %18 {strides = array<i32>} : memref<8x128xf32, #tpu.memory_space<vmem>>, vector<8x128xf32>,
    return
  }
  func.func @transform_0(%arg0: i32) -> (i32, i32) {
    %c0_i32 = arith.constant 0 : i32
    %c0_i32_0 = arith.constant 0 : i32
    %c0_i32_1 = arith.constant 0 : i32
    return %c0_i32, %c0_i32_0 : i32, i32
  }
  func.func @transform_1(%arg0: i32) -> (i32, i32, i32) {
    %c0_i32 = arith.constant 0 : i32
    %c0_i32_0 = arith.constant 0 : i32
    %c0_i32_1 = arith.constant 0 : i32
    return %arg0, %c0_i32, %c0_i32_0 : i32, i32, i32
  }
  func.func @transform_2(%arg0: i32) -> (i32, i32) {
    %c0_i32 = arith.constant 0 : i32
    %c0_i32_0 = arith.constant 0 : i32
    %c0_i32_1 = arith.constant 0 : i32
    return %c0_i32, %c0_i32_0 : i32, i32
  }
  func.func @transform_3(%arg0: i32) -> (i32, i32) {
    %c0_i32 = arith.constant 0 : i32
    %c0_i32_0 = arith.constant 0 : i32
    %c0_i32_1 = arith.constant 0 : i32
    return %c0_i32, %c0_i32_0 : i32, i32
  }
  func.func @transform_4(%arg0: i32) -> (i32, i32) {
    %c0_i32 = arith.constant 0 : i32
    %c0_i32_0 = arith.constant 0 : i32
    %c0_i32_1 = arith.constant 0 : i32
    return %c0_i32, %c0_i32_0 : i32, i32
  }
  func.func @transform_5(%arg0: i32) -> (i32, i32, i32) {
    %c0_i32 = arith.constant 0 : i32
    %c0_i32_0 = arith.constant 0 : i32
    %c0_i32_1 = arith.constant 0 : i32
    return %arg0, %c0_i32, %c0_i32_0 : i32, i32, i32
  }
}

</mosaic_0001>

<bundles_post_ra>
// kernel: tpu_custom_call.1
= control target key start
LH: loop header
LB: loop body
LE: loop exit
PB: predicated region body
PF: predicated region fallthrough
CT: control target
= control target key end

     0   :  { %10 = vsyncpa [#allocation4], 0  ;;  %s371_s0 = inlined_call_operand.hbm [shape: f32[8,128], index: 0, kind: input, shape index: {}]   ;;  %s372_s1 = inlined_call_operand.hbm [shape: f32[1,8,24], index: 1, kind: input, shape index: {}]   ;;  %s373_s2 = inlined_call_operand.hbm [shape: f32[24,128], index: 2, kind: input, shape index: {}]   ;;  %s374_s3 = inlined_call_operand.vmem [shape: f32[1,128], index: 3, kind: input, shape index: {}]   ;;  %s375_s4 = inlined_call_operand.hbm [shape: f32[128,128], index: 4, kind: input, shape index: {}]   ;;  %s376_s5 = inlined_call_operand.hbm [shape: f32[1,8,128], index: 5, kind: output, shape index: {}]  }
   0x1   :  { %11 = vsyncpa [#allocation7], 0 }
   0x2   :  { %12 = vsyncpa [#allocation10], 0  ;;  %s30_s20 = sshll.u32 %s372_s1, 4  ;;  %s31_s20 = int_to_ptr.hbm [resolvable:$true] %s30_s20 }
   0x3   :  { %13 = vsyncpa [#allocation5], 0  ;;  %s316_s21 = smov [#allocation6]   ;;  %s19_s25 = sshll.u32 %s371_s0, 4  ;;  %s20_s25 = int_to_ptr.hbm [resolvable:$true] %s19_s25 }
   0x4   :  { %s32_s22 = sshll.u32 %s316_s21, 4  ;;  %s317_s26 = smov [#allocation3]   ;;  %s33_s22 = int_to_ptr.vmem [resolvable:$true] %s32_s22 }
   0x5   :  { %35 = dma.hbm_to_vmem [thread:$0]  %s31_s20, 128, %s33_s22, [#allocation7]  }
   0x6   :  { %s21_s27 = sshll.u32 %s317_s26, 4  ;;  %s40_s30 = sshll.u32 %s373_s2, 4  ;;  %s22_s27 = int_to_ptr.vmem [resolvable:$true] %s21_s27  ;;  %s41_s30 = int_to_ptr.hbm [resolvable:$true] %s40_s30 }
   0x7   :  { %24 = dma.hbm_to_vmem [thread:$0]  %s20_s25, 128, %s22_s27, [#allocation4]  }
   0x8   :  { %s318_s1 = smov [#allocation8]   ;;  %s55_s9 = sshll.u32 %s375_s4, 4  ;;  %s56_s9 = int_to_ptr.hbm [resolvable:$true] %s55_s9 }
   0x9   :  { %s42_s6 = sshll.u32 %s318_s1, 4  ;;  %s319_s10 = smov 128   ;;  %s43_s6 = int_to_ptr.vmem [resolvable:$true] %s42_s6 }
   0xa   :  { %s320_s0 = smov 8   ;;  %s321_s11 = smov [#allocation9]  }
   0xb   :  { %48 = dma.hbm_to_vmem [thread:$0]  %s41_s30, 384, %s43_s6, [#allocation7], %s319_s10, %s319_s10, %s320_s0  }
   0xc   :  { %s57_s12 = sshll.u32 %s321_s11, 4  ;;  %s58_s12 = int_to_ptr.vmem [resolvable:$true] %s57_s12 }
   0xd   :  { %63 = dma.hbm_to_vmem [thread:$0]  %s56_s9, 2048, %s58_s12, [#allocation10], %s319_s10, %s319_s10, %s320_s0  }
   0xe   :  { %308 = dma.done.wait [#allocation4], 128  }
   0xf   :  { %309 = vsyncadd [#allocation4], 4294967168 }
  0x10   :  { %310 = dma.done.wait [#allocation7], 512  }
  0x11   :  { %311 = vsyncadd [#allocation7], 4294966784 }
  0x12   :  { %312 = dma.done.wait [#allocation10], 2048  }
  0x13   :  { %313 = vsyncadd [#allocation10], 4294965248  ;;  %v134_v0 = vld [vmem:[#allocation9 + $0x78] sm:$0xff]  ;;  %v133_v1 = vld [vmem:[#allocation9 + $0x70] sm:$0xff]  ;;  %vm94_vm0 = vcmask 195584   ;;  %s322_s13 = smov [#allocation11]  }
  0x14   :  { %137 = vmatpush.msra.mxu1 %v134_v0  ;;  %v132_v2 = vld [vmem:[#allocation9 + $0x68] sm:$0xff]  ;;  %v89_v3 = vld [vmem:[#allocation8 + $0x10] sm:$0xff]  ;;  %v88_v4 = vld [vmem:[#allocation8 + $0x8] sm:$0xff]  ;;  %s165_s14 = sshll.u32 %s322_s13, 4  ;;  %s167_s17 = sshll.u32 %s376_s5, 4  ;;  %s166_s14 = int_to_ptr.vmem [resolvable:$true] %s165_s14  ;;  %s168_s17 = int_to_ptr.hbm [resolvable:$true] %s167_s17 }
  0x15   :  { %111 = vmatpush.msra.mxu0 %v89_v3  ;;  %v131_v5 = vld [vmem:[#allocation9 + $0x60] sm:$0xff]  ;;  %v87_v6 = vld [vmem:[#allocation8] sm:$0xff]  ;;  %v130_v8 = vld [vmem:[#allocation9 + $0x58] sm:$0xff] }
  0x16   :  { %138 = vmatpush.msra.mxu1 %v133_v1  ;;  %v86_v7 = vld [vmem:[#allocation6] sm:$0xff]  ;;  %v129_v9 = vld [vmem:[#allocation9 + $0x50] sm:$0xff]  ;;  %v128_v10 = vld [vmem:[#allocation9 + $0x48] sm:$0xff] }
  0x17   :  { %112 = vmatpush.msra.mxu0 %v88_v4  ;;  %v127_v11 = vld [vmem:[#allocation9 + $0x40] sm:$0xff]  ;;  %v126_v12 = vld [vmem:[#allocation9 + $0x38] sm:$0xff]  ;;  %v125_v13 = vld [vmem:[#allocation9 + $0x30] sm:$0xff] }
  0x18   :  { %139 = vmatpush.msra.mxu1 %v132_v2  ;;  %v124_v14 = vld [vmem:[#allocation9 + $0x28] sm:$0xff]  ;;  %v123_v15 = vld [vmem:[#allocation9 + $0x20] sm:$0xff]  ;;  %v122_v16 = vld [vmem:[#allocation9 + $0x18] sm:$0xff] }
  0x19   :  { %113 = vmatpush.msra.mxu0 %v87_v6  ;;  %v121_v17 = vld [vmem:[#allocation9 + $0x10] sm:$0xff]  ;;  %v120_v18 = vld [vmem:[#allocation9 + $0x8] sm:$0xff]  ;;  %v119_v19 = vld [vmem:[#allocation9] sm:$0xff] }
  0x1a   :  { %140 = vmatpush.msra.mxu1 %v131_v5  ;;  %179 = vmatmul.msk.f32.vlgmr.msra.gmra.mxu0 %vm94_vm0, %v86_v7  ;;  %v84_v20 = vld [vmem:[#allocation3] sm:$0xff] }
  0x1b   :  { %v187_v21 = vld [vmem:[%s374_s3] ss:$0 sm:$0xff] }
  0x1c   :  { %141 = vmatpush.msra.mxu1 %v130_v8 }
  0x1e   :  { %142 = vmatpush.msra.mxu1 %v129_v9 }
  0x20   :  { %143 = vmatpush.msra.mxu1 %v128_v10 }
  0x22   :  { %144 = vmatpush.msra.mxu1 %v127_v11 }
  0x24   :  { %145 = vmatpush.msra.mxu1 %v126_v12 }
  0x26   :  { %146 = vmatpush.msra.mxu1 %v125_v13 }
  0x28   :  { %147 = vmatpush.msra.mxu1 %v124_v14 }
  0x2a   :  { %148 = vmatpush.msra.mxu1 %v123_v15 }
  0x2c   :  { %149 = vmatpush.msra.mxu1 %v122_v16 }
  0x2e   :  { %150 = vmatpush.msra.mxu1 %v121_v17 }
  0x30   :  { %151 = vmatpush.msra.mxu1 %v120_v18 }
  0x32   :  { %152 = vmatpush.msra.mxu1 %v119_v19 }
  0x33   :  { %153 = vmatmul.f32.vlgmr.msra.gmra.mxu1 %v84_v20 }
  0x97   :  { %v115_v22 = vpop.f32.mrf.mxu0 }
  0x98   :  { %v116_v23 = vadd.f32 %v187_v21, %v115_v22 }
  0xb0   :  { %v154_v24 = vpop.f32.mrf.mxu1 }
  0xb1   :  { %v157_v25 = vadd.f32 %v154_v24, %v116_v23 }
  0xb3   :  { %158 = vst [vmem:[#allocation11] sm:$0xff] %v157_v25 }
  0xb4   :  { %170 = dma.vmem_to_hbm [thread:$0]  %s166_s14, 128, %s168_s17, [#allocation5]  }
  0xb5   :  { %314 = dma.done.wait [#allocation5], 128  }
  0xb6   :  { %315 = vsyncadd [#allocation5], 4294967168 }
  0xb7   :  { %175 = vsyncpa [#allocation4], 1 }
  0xb8   :  { %176 = vsyncpa [#allocation7], 1 }
  0xb9   :  { %177 = vsyncpa [#allocation10], 1 }
  0xba   :  { %178 = vsyncpa [#allocation5], 1 }

</bundles_post_ra>
